<compile_context>
chip_gen: v7x
topology: tpu7x:2x2x1
jax: 0.10.0
libtpu: 0.0.40
codegen_flags: <defaults>
</compile_context>

<pallas_src>
import jax
import jax.numpy as jnp
from jax.experimental import pallas as pl
from jax.experimental.pallas import tpu as pltpu


def fused_mlp_kernel(x_ref, wf_ref, bf_ref, o_ref):
    # ReLU on the *input* (matches forward: fc1(self.relu(x))), in the input
    # dtype.  Note: on v5e the VPU has no native bf16, so this up/down-converts
    # per element on the bf16 path — hidden behind DMA in this mem-bound kernel.
    x = jnp.maximum(x_ref[...], jnp.zeros((), x_ref.dtype))
    # Single fused matmul on the MXU: [tile_b, D] @ [D, C] -> f32 accumulator.
    y = jnp.dot(x, wf_ref[...], preferred_element_type=jnp.float32)
    # Fused bias (already b1 @ W2 + b2), kept in f32.
    y = y + bf_ref[...]
    o_ref[...] = y.astype(o_ref.dtype)


def prepare_fused_params(w1, b1, w2, b2, compute_dtype=jnp.float32):
    """Precompute the fused weight/bias ONCE (hoist to model-load time).

    w1: [D, 128], b1: [1, 128], w2: [128, C], b2: [1, C]   (stored [in, out])
    Returns wf: [D, C] in compute_dtype, bf: [1, C] float32.
    """
    wf = jnp.dot(w1, w2, preferred_element_type=jnp.float32)          # [D, C]
    bf = jnp.dot(b1, w2, preferred_element_type=jnp.float32) + b2     # [1, C]
    return wf.astype(compute_dtype), bf.astype(jnp.float32)


def fused_classifier_forward(x, wf, bf, *, out_dtype=None, tile_b=4096,
                             vmem_limit_bytes=None):
    """Pallas forward on pre-fused params.  x: [B, D], wf: [D, C], bf: [1, C]."""
    B, D = x.shape
    Dw, C = wf.shape
    assert D == Dw, (D, Dw)
    if out_dtype is None:
        out_dtype = x.dtype
    bf = bf.reshape(1, C).astype(jnp.float32)

    # Batch tile: either the whole batch (block dim == full array dim is always
    # legal) or a sublane-aligned tile; a ragged last block handles B % tile_b.
    sublane = 16 if x.dtype == jnp.bfloat16 else 8
    if B <= tile_b:
        tile_b = B
    else:
        tile_b = max(sublane, (tile_b // sublane) * sublane)
    grid = (pl.cdiv(B, tile_b),)

    return pl.pallas_call(
        fused_mlp_kernel,
        out_shape=jax.ShapeDtypeStruct((B, C), out_dtype),
        grid_spec=pltpu.PrefetchScalarGridSpec(
            num_scalar_prefetch=0,
            grid=grid,
            in_specs=[
                pl.BlockSpec((tile_b, D), lambda i: (i, 0)),  # x tile (streamed)
                pl.BlockSpec((D, C), lambda i: (0, 0)),       # fused weight (resident)
                pl.BlockSpec((1, C), lambda i: (0, 0)),       # fused bias (resident)
            ],
            out_specs=pl.BlockSpec((tile_b, C), lambda i: (i, 0)),
        ),
        compiler_params=pltpu.CompilerParams(
            dimension_semantics=("parallel",),   # batch tiles shard across TCs (v7x)
            vmem_limit_bytes=vmem_limit_bytes,
        ),
    )(x, wf, bf)


def multiclass_classifier_forward(x, w1, b1, w2, b2, *, tile_b=4096,
                                  compute_dtype="auto", vmem_limit_bytes=None):
    """Convenience wrapper matching the PyTorch module's forward.

    compute_dtype: "auto" (default) -> bf16 for f32 inputs (halves HBM traffic;
                   f32 accumulation kept), None -> compute in x.dtype, or an
                   explicit dtype.
    NOTE: this recomputes the fused params per call; production code should
    call prepare_fused_params() once and fused_classifier_forward() per step.
    """
    out_dtype = x.dtype  # capture BEFORE any compute-dtype cast
    if compute_dtype == "auto":
        cdt = jnp.bfloat16 if x.dtype == jnp.float32 else x.dtype
    elif compute_dtype is None:
        cdt = x.dtype
    else:
        cdt = compute_dtype
    wf, bf = prepare_fused_params(w1, b1, w2, b2, compute_dtype=cdt)
    return fused_classifier_forward(x.astype(cdt), wf, bf, out_dtype=out_dtype,
                                    tile_b=tile_b, vmem_limit_bytes=vmem_limit_bytes)


def init_params(key, embedding_dim, num_classes, hidden=128):
    """Deterministic init mimicking nn.Linear defaults (uniform(-1/sqrt(fan_in), ...))."""
    k1, k2, k3, k4 = jax.random.split(key, 4)
    bound1 = 1.0 / jnp.sqrt(embedding_dim)
    bound2 = 1.0 / jnp.sqrt(hidden)
    # stored pre-transposed: [in, out]
    w1 = jax.random.uniform(k1, (embedding_dim, hidden), jnp.float32, -bound1, bound1)
    b1 = jax.random.uniform(k2, (1, hidden), jnp.float32, -bound1, bound1)
    w2 = jax.random.uniform(k3, (hidden, num_classes), jnp.float32, -bound2, bound2)
    b2 = jax.random.uniform(k4, (1, num_classes), jnp.float32, -bound2, bound2)
    return w1, b1, w2, b2


if __name__ == "__main__":
    embedding_dim = 32
    num_classes = 8
    batch = 20  # deliberately not a multiple of tile_b -> exercises the ragged last block

    key = jax.random.PRNGKey(0)
    kx, kp = jax.random.split(key)
    x = jax.random.normal(kx, (batch, embedding_dim), jnp.float32)
    w1, b1, w2, b2 = init_params(kp, embedding_dim, num_classes)

    # Pure-JAX reference (unfused, same semantics as the PyTorch forward).
    ref = (jnp.maximum(x, 0.0) @ w1 + b1) @ w2 + b2

    # 1) f32 compute path — tight tolerance (only rounding-order differs).
    out_f32 = multiclass_classifier_forward(x, w1, b1, w2, b2,
                                            tile_b=8, compute_dtype=None)
    out_f32 = jax.block_until_ready(out_f32)
    assert out_f32.shape == (batch, num_classes)
    assert out_f32.dtype == x.dtype
    assert jnp.allclose(out_f32, ref, atol=1e-4, rtol=1e-4), "f32 path mismatch vs reference"

    # 2) Default path (bf16 compute, f32 accumulation/output) — looser tolerance.
    out_def = multiclass_classifier_forward(x, w1, b1, w2, b2, tile_b=8)
    out_def = jax.block_until_ready(out_def)
    assert out_def.shape == (batch, num_classes)
    assert jnp.allclose(out_def, ref, atol=5e-2, rtol=5e-2), "bf16 path mismatch vs reference"

    # 3) Production-style hoisted fusion: fuse once, jit the per-step kernel call.
    wf, bf = prepare_fused_params(w1, b1, w2, b2, compute_dtype=jnp.bfloat16)
    fwd = jax.jit(lambda xb: fused_classifier_forward(
        xb, wf, bf, out_dtype=jnp.float32, tile_b=8))
    out_hoisted = jax.block_until_ready(fwd(x.astype(jnp.bfloat16)))
    assert out_hoisted.shape == (batch, num_classes)
    assert jnp.allclose(out_hoisted, ref, atol=5e-2, rtol=5e-2), "hoisted path mismatch"

    print("KERNEL_OK")
</pallas_src>

<mosaic_0001>
module attributes {stable_mosaic.version = 11 : i64} {
  func.func @fused_mlp_kernel(%arg0: i32, %arg1: memref<8x32xf32, #tpu.memory_space<vmem>>, %arg2: memref<32x8xf32, #tpu.memory_space<vmem>>, %arg3: memref<1x8xf32, #tpu.memory_space<vmem>>, %arg4: memref<8x8xf32, #tpu.memory_space<vmem>>) attributes {dimension_semantics = [#tpu.dimension_semantics<parallel>], iteration_bounds = array<i64: 3>, scalar_prefetch = 0 : i64, scratch_operands = 0 : i64, tpu.core_type = #tpu.core_type<tc>, window_params = [{transform_indices = @transform_0, window_bounds = array<i64: 8, 32>}, {pipeline_mode = #tpu.pipeline_mode<synchronous>, transform_indices = @transform_1, window_bounds = array<i64: 32, 8>}, {pipeline_mode = #tpu.pipeline_mode<synchronous>, transform_indices = @transform_2, window_bounds = array<i64: 1, 8>}, {transform_indices = @transform_3, window_bounds = array<i64: 8, 8>}]} {
    %c0 = arith.constant 0 : index
    %c0_0 = arith.constant 0 : index
    %0 = vector.load %arg1[%c0, %c0_0] : memref<8x32xf32, #tpu.memory_space<vmem>>, vector<8x32xf32>
    %cst = arith.constant 0.000000e+00 : f32
    %1 = vector.broadcast %cst : f32 to vector<8x32xf32>
    %2 = arith.maximumf %0, %1 : vector<8x32xf32>
    %c0_1 = arith.constant 0 : index
    %c0_2 = arith.constant 0 : index
    %3 = vector.load %arg2[%c0_1, %c0_2] : memref<32x8xf32, #tpu.memory_space<vmem>>, vector<32x8xf32>
    %cst_3 = arith.constant dense<0.000000e+00> : vector<8x8xf32>
    %4 = tpu.matmul %2, %3, %cst_3 {dimension_numbers = #tpu.dot_dimension_numbers<[1], [0], [0], [1], [0, 0, 1, 1], [], []>} : vector<8x32xf32>, vector<32x8xf32>, vector<8x8xf32> -> vector<8x8xf32>
    %c0_4 = arith.constant 0 : index
    %c0_5 = arith.constant 0 : index
    %5 = vector.load %arg3[%c0_4, %c0_5] : memref<1x8xf32, #tpu.memory_space<vmem>>, vector<1x8xf32>
    %6 = vector.broadcast %5 : vector<1x8xf32> to vector<8x8xf32>
    %7 = arith.addf %4, %6 : vector<8x8xf32>
    %c0_6 = arith.constant 0 : index
    %c0_7 = arith.constant 0 : index
    %8 = vector.load %arg4[%c0_6, %c0_7] : memref<8x8xf32, #tpu.memory_space<vmem>>, vector<8x8xf32>
    tpu.vector_store %arg4[%c0_6, %c0_7], %7 {strides = array<i32>} : memref<8x8xf32, #tpu.memory_space<vmem>>, vector<8x8xf32>,
    return
  }
  func.func @transform_0(%arg0: i32) -> (i32, i32) {
    %c0_i32 = arith.constant 0 : i32
    %c0_i32_0 = arith.constant 0 : i32
    return %arg0, %c0_i32 : i32, i32
  }
  func.func @transform_1(%arg0: i32) -> (i32, i32) {
    %c0_i32 = arith.constant 0 : i32
    %c0_i32_0 = arith.constant 0 : i32
    %c0_i32_1 = arith.constant 0 : i32
    return %c0_i32, %c0_i32_0 : i32, i32
  }
  func.func @transform_2(%arg0: i32) -> (i32, i32) {
    %c0_i32 = arith.constant 0 : i32
    %c0_i32_0 = arith.constant 0 : i32
    %c0_i32_1 = arith.constant 0 : i32
    return %c0_i32, %c0_i32_0 : i32, i32
  }
  func.func @transform_3(%arg0: i32) -> (i32, i32) {
    %c0_i32 = arith.constant 0 : i32
    %c0_i32_0 = arith.constant 0 : i32
    return %arg0, %c0_i32 : i32, i32
  }
}

</mosaic_0001>

<bundles_post_ra>
// kernel: tpu_custom_call.1
= control target key start
LH: loop header
LB: loop body
LE: loop exit
PB: predicated region body
PF: predicated region fallthrough
CT: control target
= control target key end

     0   :  { %s383_s12 = smov 0   ;;  %s415_s0 = inlined_call_operand.vmem [shape: f32[20,32], index: 0, kind: input, shape index: {}]   ;;  %s416_s1 = inlined_call_operand.vmem [shape: f32[32,8], index: 1, kind: input, shape index: {}]   ;;  %s417_s2 = inlined_call_operand.vmem [shape: f32[1,8], index: 2, kind: input, shape index: {}]   ;;  %s418_s3 = inlined_call_operand.vmem [shape: f32[20,8], index: 3, kind: output, shape index: {}]  }
   0x1 LB: > { %s308_s13 = sadd.s32 4294967295, %s358_s12   ;;  %p312_p0 = scmp.ge.s32.totalorder %s358_s12, 1  ;;  %s358_s12 = sphi %s383_s12, %s13_s12  }
   0x2   : > { %p136_p1 = scmp.lt.s32.totalorder %s358_s12, 4 }
   0x4   : > { %p137_p2 = pnand %p312_p0, %p136_p1 }
   0x5   : > { %v168_v0 = vld [vmem:[%s416_s1] sm:$0xff] (!%p137_p2)  ;;  %v169_v1 = vld [vmem:[%s416_s1 + $0x8] sm:$0xff] (!%p137_p2)  ;;  %v170_v2 = vld [vmem:[%s416_s1 + $0x10] sm:$0xff] (!%p137_p2)  ;;  %v360_v3 = vmov (!%p137_p2), 0.0|0.0   ;;  %vm361_vm0 = vmmov (!%p137_p2), 0   ;;  %v362_v6 = vmov (!%p137_p2), 0.0  }
   0x6   : > { %140 = sbr.rel (%p137_p2) target bundleno = 234 (0xea), region = 32  ;;  %335 = vmatprep.subr.bf16.mxu0 (!%p137_p2), %v360_v3  ;;  %v336_v4 = vpack.c.bf16 (!%p137_p2), %v169_v1, %v168_v0  ;;  %v171_v5 = vld [vmem:[%s416_s1 + $0x18] sm:$0xff] (!%p137_p2)  ;;  %332 = vmatprep.mubr.msk.f32.mxu0 (!%p137_p2), %vm361_vm0, %v362_v6  ;;  %p158_p3 = scmp.lt.s32.totalorder (!%p137_p2), %s308_s13, 2  ;;  %vm179_vm1 = vcmask (!%p137_p2), 261120   ;;  %v315_v10 = vld [vmem:[%s417_s2] ss:$0 sm:$0xff] (!%p137_p2) }
   0x7   : > { %v339_v7 = vpack.c.bf16 (!%p137_p2), %v171_v5, %v170_v2  ;;  %vm253_vm2 = vcmask (!%p137_p2), 64512  }
   0x8   : > { %337 = vmatpush3.bf16.msra.mxu0 (!%p137_p2), %v336_v4 }
   0x9   : > { %338 = vmatprep.subr.bf16.mxu0 (!%p137_p2), %v360_v3 }
   0xc   : > { %340 = vmatpush3.bf16.msra.mxu0 (!%p137_p2), %v339_v7 }
   0xd   : > { %s420_s13 = smov (!%p158_p3, %s308_s13), 2 }
   0xe   : > { %s313_s22 = sshll.u32 %s420_s13, 3 }
   0xf   : > { %s161_s25 = scalar_lea.vmem %s415_s0, %s313_s22  ;;  %s165_s30 = scalar_lea.vmem %s418_s3, %s313_s22 }
  0x10   : > { %v166_v8 = vld [vmem:[%s161_s25] sm:$0xff] }
  0x11   : > { %v167_v9 = vmax.f32 %v166_v8, 0.0 }
  0x13   : > { %333 = vmatmul.mubr.msk.f32.vlgmr.msra.gmra.mrb[0].mxu0 %vm179_vm1, %v167_v9 }
  0xe6   : > { %v249_v11 = vpop.f32.mrb[0].mxu0 }
  0xe7   : > { %v250_v12 = vadd.f32 %v315_v10, %v249_v11  ;;  %v334_v13 = vpop.f32.mrb[1].mxu0 }
  0xe9   : > { %254 = vst.msk [vmem:[%s165_s30] sm:$0xff] %vm253_vm2, %v250_v12 }
  0xea PF: > { %s13_s12 = sadd.s32 1, %s358_s12  }
  0xeb   : > { %p10_p4 = scmp.ge.s32.totalorder %s13_s12, 5  }
  0xed   :  { %12 = sbr.rel (!%p10_p4) target bundleno = 1 (0x1), region = 62 }

</bundles_post_ra>
